<compile_context>
chip_gen: v5e
topology: v5e:2x2
jax: 0.10.0
libtpu: 0.0.40
codegen_flags: <defaults>
</compile_context>

<pallas_src>
import numpy as np
import jax
import jax.numpy as jnp
from jax.experimental import pallas as pl
from jax.experimental.pallas import tpu as pltpu

N_QUBITS = 6
DIM = 2 ** N_QUBITS          # 64
LANE = 128                   # fused statevector width / padded output width


def _round_up(n, m):
    return ((n + m - 1) // m) * m


def _const_index_map(ndim):
    return lambda i: (0,) * ndim


# ----------------------------- Pallas kernel --------------------------------
def _qcnn_kernel(x_ref, w1, b1, w2, b2, w3d, b3d, phase, sel,
                 ucat, zsw4, b4, w5p, b5p, out_ref):
    f32 = jnp.float32
    x = x_ref[...]

    # pre_process: Linear(ns,32)+ReLU -> Dropout(id) -> Linear(32,16)+ReLU
    h = jnp.maximum(jnp.dot(x, w1[...], preferred_element_type=f32) + b1[...], 0.0)
    h = jnp.maximum(jnp.dot(h, w2[...], preferred_element_type=f32) + b2[...], 0.0)

    # Linear(16,6)+Tanh, duplicated host-side to 12 cols: pre2 = [pre | pre]
    pre2 = jnp.tanh(jnp.dot(h, w3d[...], preferred_element_type=f32) + b3d[...])   # (TB,12)
    # cs = [cos(pre*pi/2) | sin(pre*pi/2)]  via phase = [0]*6 + [-pi/2]*6
    # (tanh output is already in [-1,1], so the reference clip is an identity)
    cs = jnp.cos(pre2 * f32(np.pi * 0.5) + phase[...])                              # (TB,12)

    # RY data-encoding amplitudes via constant 0/1 selector matmuls on the MXU.
    # factor_i = cs @ Sel_i selects c_i or s_i per basis state; product tree keeps
    # at most ~2 live (TB,64) intermediates.
    f01 = (jnp.dot(cs, sel[0], preferred_element_type=f32) *
           jnp.dot(cs, sel[1], preferred_element_type=f32))
    f23 = (jnp.dot(cs, sel[2], preferred_element_type=f32) *
           jnp.dot(cs, sel[3], preferred_element_type=f32))
    amp = f01 * f23
    f45 = (jnp.dot(cs, sel[4], preferred_element_type=f32) *
           jnp.dot(cs, sel[5], preferred_element_type=f32))
    amp = amp * f45                                                                 # (TB,64)

    # statevector: psi = amp @ [U_r^T | U_i^T]   (lane-full (64,128), f32 for accuracy)
    psi = jnp.dot(amp, ucat[...], preferred_element_type=f32)                       # (TB,128)
    psisq = psi * psi                                                               # Re^2|Im^2

    # <Z_i> folded into first post-MLP layer: h2 = relu(psisq @ ([zs;zs] @ w4) + b4)
    h2 = jnp.maximum(jnp.dot(psisq, zsw4[...], preferred_element_type=f32) + b4[...], 0.0)

    # final layer in bf16, lane-dense padded output, bf16 writeback
    out = jnp.dot(h2.astype(w5p.dtype), w5p[...], preferred_element_type=f32) + b5p[...]
    out_ref[...] = out.astype(out_ref.dtype)


_KERNEL_PARAM_KEYS = ("w1", "b1", "w2", "b2", "w3d", "b3d", "phase", "sel",
                      "ucat", "zsw4", "b4", "w5p", "b5p")


def quantum_cnn_forward(x, params, n_departments, block_b=1024):
    """Fused QuantumCNN forward; returns (B, n_departments) bfloat16."""
    B, NS = x.shape
    NP = params["w5p"].shape[1]                       # padded output width (mult. of 128)

    block_b = max(8, (block_b // 8) * 8)              # batch tile must be a multiple of 8
    Bp8 = _round_up(B, 8)
    if Bp8 > 8:
        # aim for >= 2 grid steps so the "parallel" axis shards across both TCs on v7x
        TB = min(block_b, _round_up((Bp8 + 1) // 2, 8))
    else:
        TB = Bp8
    Bp = _round_up(B, TB)
    xp = jnp.pad(x, ((0, Bp - B), (0, 0))) if Bp != B else x

    weights = [params[k] for k in _KERNEL_PARAM_KEYS]
    in_specs = ([pl.BlockSpec((TB, NS), lambda i: (i, 0))] +
                [pl.BlockSpec(w.shape, _const_index_map(w.ndim)) for w in weights])

    out = pl.pallas_call(
        _qcnn_kernel,
        out_shape=jax.ShapeDtypeStruct((Bp, NP), jnp.bfloat16),
        grid=(Bp // TB,),
        in_specs=in_specs,
        out_specs=pl.BlockSpec((TB, NP), lambda i: (i, 0)),
        compiler_params=pltpu.CompilerParams(
            dimension_semantics=("parallel",),
            vmem_limit_bytes=32 * 1024 * 1024),
    )(xp, *weights)
    return out[:B, :n_departments]


# ------------------- circuit-unitary construction (glue, numpy) -------------
def _build_circuit_unitary(weights):
    """64x64 unitary for everything after the RY data-encoding layer."""
    I2 = np.eye(2, dtype=np.complex128)

    def RX(t):
        c, s = np.cos(t / 2), np.sin(t / 2)
        return np.array([[c, -1j * s], [-1j * s, c]], dtype=np.complex128)

    def RY(t):
        c, s = np.cos(t / 2), np.sin(t / 2)
        return np.array([[c, -s], [s, c]], dtype=np.complex128)

    def RZ(t):
        return np.array([[np.exp(-1j * t / 2), 0], [0, np.exp(1j * t / 2)]],
                        dtype=np.complex128)

    def single(gate, wire):
        m = np.array([[1.0]], dtype=np.complex128)
        for w in range(N_QUBITS):
            m = np.kron(m, gate if w == wire else I2)
        return m

    def cnot(ctrl, tgt):
        M = np.zeros((DIM, DIM), dtype=np.complex128)
        for b in range(DIM):
            if (b >> (N_QUBITS - 1 - ctrl)) & 1:
                nb = b ^ (1 << (N_QUBITS - 1 - tgt))
            else:
                nb = b
            M[nb, b] = 1.0
        return M

    U = np.eye(DIM, dtype=np.complex128)
    for i in range(N_QUBITS):
        U = single(RX(weights[0, i]), i) @ U
        U = single(RZ(weights[1, i]), i) @ U
    for i in range(N_QUBITS - 1):
        U = cnot(i, i + 1) @ U
    U = cnot(N_QUBITS - 1, 0) @ U
    for i in range(N_QUBITS):
        U = single(RY(weights[2, i]), i) @ U
        U = single(RZ(weights[3, i]), i) @ U
    for i in range(0, N_QUBITS, 2):
        U = cnot(i, (i + 1) % N_QUBITS) @ U
    for i in range(N_QUBITS):
        U = single(RX(weights[4, i]), i) @ U
    return U


def _z_signs():
    zs = np.zeros((DIM, N_QUBITS), dtype=np.float32)
    for b in range(DIM):
        for i in range(N_QUBITS):
            zs[b, i] = 1.0 - 2.0 * ((b >> (N_QUBITS - 1 - i)) & 1)
    return zs


def _encoding_selectors():
    """sel[i] (12,64): column j picks c_i (row i) if bit_i(j)==0 else s_i (row 6+i)."""
    sel = np.zeros((N_QUBITS, 2 * N_QUBITS, DIM), dtype=np.float32)
    for i in range(N_QUBITS):
        for j in range(DIM):
            bit = (j >> (N_QUBITS - 1 - i)) & 1
            sel[i, N_QUBITS * bit + i, j] = 1.0
    return sel


# --------------------------- parameter construction --------------------------
def make_params(key, n_symptoms, n_departments):
    def linear(k, fan_in, fan_out):
        k1, k2 = jax.random.split(k)
        bound = 1.0 / np.sqrt(fan_in)
        w = jax.random.uniform(k1, (fan_in, fan_out), jnp.float32, -bound, bound)
        b = jax.random.uniform(k2, (1, fan_out), jnp.float32, -bound, bound)
        return w, b

    ks = jax.random.split(key, 6)
    w1, b1 = linear(ks[0], n_symptoms, 32)
    w2, b2 = linear(ks[1], 32, 16)
    w3, b3 = linear(ks[2], 16, N_QUBITS)
    w4, b4 = linear(ks[3], N_QUBITS, 16)
    w5, b5 = linear(ks[4], 16, n_departments)
    q_weights = jax.random.normal(ks[5], (5, N_QUBITS), jnp.float32)

    U = _build_circuit_unitary(np.asarray(q_weights, dtype=np.float64))
    urT = jnp.asarray(U.real.T, dtype=jnp.float32)   # psi_row @ U^T == (U @ psi_col)^T
    uiT = jnp.asarray(U.imag.T, dtype=jnp.float32)
    zs = jnp.asarray(_z_signs())

    # fused / padded kernel-side parameters
    w3d = jnp.concatenate([w3, w3], axis=1)                              # (16, 12)
    b3d = jnp.concatenate([b3, b3], axis=1)                              # (1, 12)
    phase = jnp.asarray([[0.0] * N_QUBITS + [-np.pi / 2] * N_QUBITS],
                        dtype=jnp.float32)                               # (1, 12)
    sel = jnp.asarray(_encoding_selectors())                             # (6, 12, 64)
    ucat = jnp.concatenate([urT, uiT], axis=1)                           # (64, 128) f32
    zsw4 = jnp.concatenate([zs, zs], axis=0) @ w4                        # (128, 16)
    npad = _round_up(n_departments, LANE)
    w5p = (jnp.zeros((16, npad), jnp.float32)
           .at[:, :n_departments].set(w5).astype(jnp.bfloat16))          # (16, 128) bf16
    b5p = jnp.zeros((1, npad), jnp.float32).at[:, :n_departments].set(b5)

    return dict(w1=w1, b1=b1, w2=w2, b2=b2, w3d=w3d, b3d=b3d, phase=phase, sel=sel,
                ucat=ucat, zsw4=zsw4, b4=b4, w5p=w5p, b5p=b5p,
                # un-fused f32 copies kept only for the pure-JAX reference check
                w3=w3, b3=b3, urT=urT, uiT=uiT, zs=zs, w4=w4, w5=w5, b5=b5)


# ------------------------------ reference (check) ----------------------------
def _reference_forward(x, p):
    h = jnp.maximum(x @ p["w1"] + p["b1"], 0.0)
    h = jnp.maximum(h @ p["w2"] + p["b2"], 0.0)
    pre = jnp.tanh(h @ p["w3"] + p["b3"])
    theta = jnp.clip(pre, -1.0, 1.0) * jnp.float32(np.pi)
    c, s = jnp.cos(theta / 2), jnp.sin(theta / 2)
    idx = jnp.arange(DIM)[None, :]
    amp = jnp.ones((x.shape[0], DIM), jnp.float32)
    for i in range(N_QUBITS):
        bit = (idx >> (N_QUBITS - 1 - i)) & 1
        amp = amp * jnp.where(bit == 1, s[:, i:i + 1], c[:, i:i + 1])
    psi_r = amp @ p["urT"]
    psi_i = amp @ p["uiT"]
    expz = (psi_r ** 2 + psi_i ** 2) @ p["zs"]
    h2 = jnp.maximum(expz @ p["w4"] + p["b4"], 0.0)
    return h2 @ p["w5"] + p["b5"]


# ----------------------------------- main ------------------------------------
if __name__ == "__main__":
    n_symptoms, n_departments = 16, 8
    key = jax.random.PRNGKey(0)
    k_param, k_x1, k_x2 = jax.random.split(key, 3)
    params = make_params(k_param, n_symptoms, n_departments)

    # small-batch case (single (8,128)-aligned tile, single grid step)
    batch = 4
    x = jax.random.normal(k_x1, (batch, n_symptoms), jnp.float32)
    out = jax.block_until_ready(quantum_cnn_forward(x, params, n_departments))
    ref = jax.block_until_ready(_reference_forward(x, params))
    assert out.shape == (batch, n_departments)
    np.testing.assert_allclose(np.asarray(out.astype(jnp.float32)),
                               np.asarray(ref), rtol=2e-2, atol=2e-2)

    # default block_b: batch split into >=2 grid steps (v7x dual-TC path, padded tail)
    batch2 = 20
    x2 = jax.random.normal(k_x2, (batch2, n_symptoms), jnp.float32)
    out2 = jax.block_until_ready(quantum_cnn_forward(x2, params, n_departments))
    ref2 = jax.block_until_ready(_reference_forward(x2, params))
    assert out2.shape == (batch2, n_departments)
    np.testing.assert_allclose(np.asarray(out2.astype(jnp.float32)),
                               np.asarray(ref2), rtol=2e-2, atol=2e-2)

    # small explicit tile: multi-step grid with resident weights across steps
    out3 = jax.block_until_ready(quantum_cnn_forward(x2, params, n_departments, block_b=8))
    np.testing.assert_allclose(np.asarray(out3.astype(jnp.float32)),
                               np.asarray(ref2), rtol=2e-2, atol=2e-2)

    print("KERNEL_OK")
</pallas_src>

<mosaic_0001>
module attributes {stable_mosaic.version = 11 : i64} {
  func.func @_qcnn_kernel(%arg0: i32, %arg1: memref<8x16xf32, #tpu.memory_space<vmem>>, %arg2: memref<16x32xf32, #tpu.memory_space<vmem>>, %arg3: memref<1x32xf32, #tpu.memory_space<vmem>>, %arg4: memref<32x16xf32, #tpu.memory_space<vmem>>, %arg5: memref<1x16xf32, #tpu.memory_space<vmem>>, %arg6: memref<16x12xf32, #tpu.memory_space<vmem>>, %arg7: memref<1x12xf32, #tpu.memory_space<vmem>>, %arg8: memref<1x12xf32, #tpu.memory_space<vmem>>, %arg9: memref<6x12x64xf32, #tpu.memory_space<vmem>>, %arg10: memref<64x128xf32, #tpu.memory_space<vmem>>, %arg11: memref<128x16xf32, #tpu.memory_space<vmem>>, %arg12: memref<1x16xf32, #tpu.memory_space<vmem>>, %arg13: memref<16x128xbf16, #tpu.memory_space<vmem>>, %arg14: memref<1x128xf32, #tpu.memory_space<vmem>>, %arg15: memref<8x128xbf16, #tpu.memory_space<vmem>>) attributes {dimension_semantics = [#tpu.dimension_semantics<parallel>], iteration_bounds = array<i64: 1>, scalar_prefetch = 0 : i64, scratch_operands = 0 : i64, tpu.core_type = #tpu.core_type<tc>, window_params = [{transform_indices = @transform_0, window_bounds = array<i64: 8, 16>}, {pipeline_mode = #tpu.pipeline_mode<synchronous>, transform_indices = @transform_1, window_bounds = array<i64: 16, 32>}, {pipeline_mode = #tpu.pipeline_mode<synchronous>, transform_indices = @transform_2, window_bounds = array<i64: 1, 32>}, {pipeline_mode = #tpu.pipeline_mode<synchronous>, transform_indices = @transform_3, window_bounds = array<i64: 32, 16>}, {pipeline_mode = #tpu.pipeline_mode<synchronous>, transform_indices = @transform_4, window_bounds = array<i64: 1, 16>}, {pipeline_mode = #tpu.pipeline_mode<synchronous>, transform_indices = @transform_5, window_bounds = array<i64: 16, 12>}, {pipeline_mode = #tpu.pipeline_mode<synchronous>, transform_indices = @transform_6, window_bounds = array<i64: 1, 12>}, {pipeline_mode = #tpu.pipeline_mode<synchronous>, transform_indices = @transform_7, window_bounds = array<i64: 1, 12>}, {pipeline_mode = #tpu.pipeline_mode<synchronous>, transform_indices = @transform_8, window_bounds = array<i64: 6, 12, 64>}, {pipeline_mode = #tpu.pipeline_mode<synchronous>, transform_indices = @transform_9, window_bounds = array<i64: 64, 128>}, {pipeline_mode = #tpu.pipeline_mode<synchronous>, transform_indices = @transform_10, window_bounds = array<i64: 128, 16>}, {pipeline_mode = #tpu.pipeline_mode<synchronous>, transform_indices = @transform_11, window_bounds = array<i64: 1, 16>}, {pipeline_mode = #tpu.pipeline_mode<synchronous>, transform_indices = @transform_12, window_bounds = array<i64: 16, 128>}, {pipeline_mode = #tpu.pipeline_mode<synchronous>, transform_indices = @transform_13, window_bounds = array<i64: 1, 128>}, {transform_indices = @transform_14, window_bounds = array<i64: 8, 128>}]} {
    %c0 = arith.constant 0 : index
    %c0_0 = arith.constant 0 : index
    %0 = vector.load %arg1[%c0, %c0_0] : memref<8x16xf32, #tpu.memory_space<vmem>>, vector<8x16xf32>
    %c0_1 = arith.constant 0 : index
    %c0_2 = arith.constant 0 : index
    %1 = vector.load %arg2[%c0_1, %c0_2] : memref<16x32xf32, #tpu.memory_space<vmem>>, vector<16x32xf32>
    %cst = arith.constant dense<0.000000e+00> : vector<8x32xf32>
    %2 = tpu.matmul %0, %1, %cst {dimension_numbers = #tpu.dot_dimension_numbers<[1], [0], [0], [1], [0, 0, 1, 1], [], []>} : vector<8x16xf32>, vector<16x32xf32>, vector<8x32xf32> -> vector<8x32xf32>
    %c0_3 = arith.constant 0 : index
    %c0_4 = arith.constant 0 : index
    %3 = vector.load %arg3[%c0_3, %c0_4] : memref<1x32xf32, #tpu.memory_space<vmem>>, vector<1x32xf32>
    %4 = vector.broadcast %3 : vector<1x32xf32> to vector<8x32xf32>
    %5 = arith.addf %2, %4 : vector<8x32xf32>
    %cst_5 = arith.constant 0.000000e+00 : f32
    %6 = vector.broadcast %cst_5 : f32 to vector<8x32xf32>
    %7 = arith.maximumf %5, %6 : vector<8x32xf32>
    %c0_6 = arith.constant 0 : index
    %c0_7 = arith.constant 0 : index
    %8 = vector.load %arg4[%c0_6, %c0_7] : memref<32x16xf32, #tpu.memory_space<vmem>>, vector<32x16xf32>
    %cst_8 = arith.constant dense<0.000000e+00> : vector<8x16xf32>
    %9 = tpu.matmul %7, %8, %cst_8 {dimension_numbers = #tpu.dot_dimension_numbers<[1], [0], [0], [1], [0, 0, 1, 1], [], []>} : vector<8x32xf32>, vector<32x16xf32>, vector<8x16xf32> -> vector<8x16xf32>
    %c0_9 = arith.constant 0 : index
    %c0_10 = arith.constant 0 : index
    %10 = vector.load %arg5[%c0_9, %c0_10] : memref<1x16xf32, #tpu.memory_space<vmem>>, vector<1x16xf32>
    %11 = vector.broadcast %10 : vector<1x16xf32> to vector<8x16xf32>
    %12 = arith.addf %9, %11 : vector<8x16xf32>
    %cst_11 = arith.constant 0.000000e+00 : f32
    %13 = vector.broadcast %cst_11 : f32 to vector<8x16xf32>
    %14 = arith.maximumf %12, %13 : vector<8x16xf32>
    %c0_12 = arith.constant 0 : index
    %c0_13 = arith.constant 0 : index
    %15 = vector.load %arg6[%c0_12, %c0_13] : memref<16x12xf32, #tpu.memory_space<vmem>>, vector<16x12xf32>
    %cst_14 = arith.constant dense<0.000000e+00> : vector<8x12xf32>
    %16 = tpu.matmul %14, %15, %cst_14 {dimension_numbers = #tpu.dot_dimension_numbers<[1], [0], [0], [1], [0, 0, 1, 1], [], []>} : vector<8x16xf32>, vector<16x12xf32>, vector<8x12xf32> -> vector<8x12xf32>
    %c0_15 = arith.constant 0 : index
    %c0_16 = arith.constant 0 : index
    %17 = vector.load %arg7[%c0_15, %c0_16] : memref<1x12xf32, #tpu.memory_space<vmem>>, vector<1x12xf32>
    %18 = vector.broadcast %17 : vector<1x12xf32> to vector<8x12xf32>
    %19 = arith.addf %16, %18 : vector<8x12xf32>
    %20 = math.tanh %19 : vector<8x12xf32>
    %cst_17 = arith.constant 1.57079637 : f32
    %21 = vector.broadcast %cst_17 : f32 to vector<8x12xf32>
    %22 = arith.mulf %20, %21 : vector<8x12xf32>
    %c0_18 = arith.constant 0 : index
    %c0_19 = arith.constant 0 : index
    %23 = vector.load %arg8[%c0_18, %c0_19] : memref<1x12xf32, #tpu.memory_space<vmem>>, vector<1x12xf32>
    %24 = vector.broadcast %23 : vector<1x12xf32> to vector<8x12xf32>
    %25 = arith.addf %22, %24 : vector<8x12xf32>
    %26 = math.cos %25 : vector<8x12xf32>
    %c0_20 = arith.constant 0 : index
    %c0_21 = arith.constant 0 : index
    %c0_22 = arith.constant 0 : index
    %27 = vector.load %arg9[%c0_20, %c0_21, %c0_22] : memref<6x12x64xf32, #tpu.memory_space<vmem>>, vector<1x12x64xf32>
    %28 = vector.shape_cast %27 : vector<1x12x64xf32> to vector<12x64xf32>
    %cst_23 = arith.constant dense<0.000000e+00> : vector<8x64xf32>
    %29 = tpu.matmul %26, %28, %cst_23 {dimension_numbers = #tpu.dot_dimension_numbers<[1], [0], [0], [1], [0, 0, 1, 1], [], []>} : vector<8x12xf32>, vector<12x64xf32>, vector<8x64xf32> -> vector<8x64xf32>
    %c1 = arith.constant 1 : index
    %c0_24 = arith.constant 0 : index
    %c0_25 = arith.constant 0 : index
    %30 = vector.load %arg9[%c1, %c0_24, %c0_25] : memref<6x12x64xf32, #tpu.memory_space<vmem>>, vector<1x12x64xf32>
    %31 = vector.shape_cast %30 : vector<1x12x64xf32> to vector<12x64xf32>
    %cst_26 = arith.constant dense<0.000000e+00> : vector<8x64xf32>
    %32 = tpu.matmul %26, %31, %cst_26 {dimension_numbers = #tpu.dot_dimension_numbers<[1], [0], [0], [1], [0, 0, 1, 1], [], []>} : vector<8x12xf32>, vector<12x64xf32>, vector<8x64xf32> -> vector<8x64xf32>
    %33 = arith.mulf %29, %32 : vector<8x64xf32>
    %c2 = arith.constant 2 : index
    %c0_27 = arith.constant 0 : index
    %c0_28 = arith.constant 0 : index
    %34 = vector.load %arg9[%c2, %c0_27, %c0_28] : memref<6x12x64xf32, #tpu.memory_space<vmem>>, vector<1x12x64xf32>
    %35 = vector.shape_cast %34 : vector<1x12x64xf32> to vector<12x64xf32>
    %cst_29 = arith.constant dense<0.000000e+00> : vector<8x64xf32>
    %36 = tpu.matmul %26, %35, %cst_29 {dimension_numbers = #tpu.dot_dimension_numbers<[1], [0], [0], [1], [0, 0, 1, 1], [], []>} : vector<8x12xf32>, vector<12x64xf32>, vector<8x64xf32> -> vector<8x64xf32>
    %c3 = arith.constant 3 : index
    %c0_30 = arith.constant 0 : index
    %c0_31 = arith.constant 0 : index
    %37 = vector.load %arg9[%c3, %c0_30, %c0_31] : memref<6x12x64xf32, #tpu.memory_space<vmem>>, vector<1x12x64xf32>
    %38 = vector.shape_cast %37 : vector<1x12x64xf32> to vector<12x64xf32>
    %cst_32 = arith.constant dense<0.000000e+00> : vector<8x64xf32>
    %39 = tpu.matmul %26, %38, %cst_32 {dimension_numbers = #tpu.dot_dimension_numbers<[1], [0], [0], [1], [0, 0, 1, 1], [], []>} : vector<8x12xf32>, vector<12x64xf32>, vector<8x64xf32> -> vector<8x64xf32>
    %40 = arith.mulf %36, %39 : vector<8x64xf32>
    %41 = arith.mulf %33, %40 : vector<8x64xf32>
    %c4 = arith.constant 4 : index
    %c0_33 = arith.constant 0 : index
    %c0_34 = arith.constant 0 : index
    %42 = vector.load %arg9[%c4, %c0_33, %c0_34] : memref<6x12x64xf32, #tpu.memory_space<vmem>>, vector<1x12x64xf32>
    %43 = vector.shape_cast %42 : vector<1x12x64xf32> to vector<12x64xf32>
    %cst_35 = arith.constant dense<0.000000e+00> : vector<8x64xf32>
    %44 = tpu.matmul %26, %43, %cst_35 {dimension_numbers = #tpu.dot_dimension_numbers<[1], [0], [0], [1], [0, 0, 1, 1], [], []>} : vector<8x12xf32>, vector<12x64xf32>, vector<8x64xf32> -> vector<8x64xf32>
    %c5 = arith.constant 5 : index
    %c0_36 = arith.constant 0 : index
    %c0_37 = arith.constant 0 : index
    %45 = vector.load %arg9[%c5, %c0_36, %c0_37] : memref<6x12x64xf32, #tpu.memory_space<vmem>>, vector<1x12x64xf32>
    %46 = vector.shape_cast %45 : vector<1x12x64xf32> to vector<12x64xf32>
    %cst_38 = arith.constant dense<0.000000e+00> : vector<8x64xf32>
    %47 = tpu.matmul %26, %46, %cst_38 {dimension_numbers = #tpu.dot_dimension_numbers<[1], [0], [0], [1], [0, 0, 1, 1], [], []>} : vector<8x12xf32>, vector<12x64xf32>, vector<8x64xf32> -> vector<8x64xf32>
    %48 = arith.mulf %44, %47 : vector<8x64xf32>
    %49 = arith.mulf %41, %48 : vector<8x64xf32>
    %c0_39 = arith.constant 0 : index
    %c0_40 = arith.constant 0 : index
    %50 = vector.load %arg10[%c0_39, %c0_40] : memref<64x128xf32, #tpu.memory_space<vmem>>, vector<64x128xf32>
    %cst_41 = arith.constant dense<0.000000e+00> : vector<8x128xf32>
    %51 = tpu.matmul %49, %50, %cst_41 {dimension_numbers = #tpu.dot_dimension_numbers<[1], [0], [0], [1], [0, 0, 1, 1], [], []>} : vector<8x64xf32>, vector<64x128xf32>, vector<8x128xf32> -> vector<8x128xf32>
    %52 = arith.mulf %51, %51 : vector<8x128xf32>
    %c0_42 = arith.constant 0 : index
    %c0_43 = arith.constant 0 : index
    %53 = vector.load %arg11[%c0_42, %c0_43] : memref<128x16xf32, #tpu.memory_space<vmem>>, vector<128x16xf32>
    %cst_44 = arith.constant dense<0.000000e+00> : vector<8x16xf32>
    %54 = tpu.matmul %52, %53, %cst_44 {dimension_numbers = #tpu.dot_dimension_numbers<[1], [0], [0], [1], [0, 0, 1, 1], [], []>} : vector<8x128xf32>, vector<128x16xf32>, vector<8x16xf32> -> vector<8x16xf32>
    %c0_45 = arith.constant 0 : index
    %c0_46 = arith.constant 0 : index
    %55 = vector.load %arg12[%c0_45, %c0_46] : memref<1x16xf32, #tpu.memory_space<vmem>>, vector<1x16xf32>
    %56 = vector.broadcast %55 : vector<1x16xf32> to vector<8x16xf32>
    %57 = arith.addf %54, %56 : vector<8x16xf32>
    %cst_47 = arith.constant 0.000000e+00 : f32
    %58 = vector.broadcast %cst_47 : f32 to vector<8x16xf32>
    %59 = arith.maximumf %57, %58 : vector<8x16xf32>
    %60 = arith.truncf %59 : vector<8x16xf32> to vector<8x16xbf16>
    %c0_48 = arith.constant 0 : index
    %c0_49 = arith.constant 0 : index
    %61 = vector.load %arg13[%c0_48, %c0_49] : memref<16x128xbf16, #tpu.memory_space<vmem>>, vector<16x128xbf16>
    %cst_50 = arith.constant dense<0.000000e+00> : vector<8x128xf32>
    %62 = tpu.matmul %60, %61, %cst_50 {dimension_numbers = #tpu.dot_dimension_numbers<[1], [0], [0], [1], [0, 0, 1, 1], [], []>} : vector<8x16xbf16>, vector<16x128xbf16>, vector<8x128xf32> -> vector<8x128xf32>
    %c0_51 = arith.constant 0 : index
    %c0_52 = arith.constant 0 : index
    %63 = vector.load %arg14[%c0_51, %c0_52] : memref<1x128xf32, #tpu.memory_space<vmem>>, vector<1x128xf32>
    %64 = vector.broadcast %63 : vector<1x128xf32> to vector<8x128xf32>
    %65 = arith.addf %62, %64 : vector<8x128xf32>
    %66 = arith.truncf %65 : vector<8x128xf32> to vector<8x128xbf16>
    %c0_53 = arith.constant 0 : index
    %c0_54 = arith.constant 0 : index
    %67 = vector.load %arg15[%c0_53, %c0_54] : memref<8x128xbf16, #tpu.memory_space<vmem>>, vector<8x128xbf16>
    tpu.vector_store %arg15[%c0_53, %c0_54], %66 {strides = array<i32>} : memref<8x128xbf16, #tpu.memory_space<vmem>>, vector<8x128xbf16>,
    return
  }
  func.func @transform_0(%arg0: i32) -> (i32, i32) {
    %c0_i32 = arith.constant 0 : i32
    %c0_i32_0 = arith.constant 0 : i32
    return %arg0, %c0_i32 : i32, i32
  }
  func.func @transform_1(%arg0: i32) -> (i32, i32) {
    %c0_i32 = arith.constant 0 : i32
    %c0_i32_0 = arith.constant 0 : i32
    %c0_i32_1 = arith.constant 0 : i32
    return %c0_i32, %c0_i32_0 : i32, i32
  }
  func.func @transform_2(%arg0: i32) -> (i32, i32) {
    %c0_i32 = arith.constant 0 : i32
    %c0_i32_0 = arith.constant 0 : i32
    %c0_i32_1 = arith.constant 0 : i32
    return %c0_i32, %c0_i32_0 : i32, i32
  }
  func.func @transform_3(%arg0: i32) -> (i32, i32) {
    %c0_i32 = arith.constant 0 : i32
    %c0_i32_0 = arith.constant 0 : i32
    %c0_i32_1 = arith.constant 0 : i32
    return %c0_i32, %c0_i32_0 : i32, i32
  }
  func.func @transform_4(%arg0: i32) -> (i32, i32) {
    %c0_i32 = arith.constant 0 : i32
    %c0_i32_0 = arith.constant 0 : i32
    %c0_i32_1 = arith.constant 0 : i32
    return %c0_i32, %c0_i32_0 : i32, i32
  }
  func.func @transform_5(%arg0: i32) -> (i32, i32) {
    %c0_i32 = arith.constant 0 : i32
    %c0_i32_0 = arith.constant 0 : i32
    %c0_i32_1 = arith.constant 0 : i32
    return %c0_i32, %c0_i32_0 : i32, i32
  }
  func.func @transform_6(%arg0: i32) -> (i32, i32) {
    %c0_i32 = arith.constant 0 : i32
    %c0_i32_0 = arith.constant 0 : i32
    %c0_i32_1 = arith.constant 0 : i32
    return %c0_i32, %c0_i32_0 : i32, i32
  }
  func.func @transform_7(%arg0: i32) -> (i32, i32) {
    %c0_i32 = arith.constant 0 : i32
    %c0_i32_0 = arith.constant 0 : i32
    %c0_i32_1 = arith.constant 0 : i32
    return %c0_i32, %c0_i32_0 : i32, i32
  }
  func.func @transform_8(%arg0: i32) -> (i32, i32, i32) {
    %c0_i32 = arith.constant 0 : i32
    %c0_i32_0 = arith.constant 0 : i32
    %c0_i32_1 = arith.constant 0 : i32
    %c0_i32_2 = arith.constant 0 : i32
    return %c0_i32, %c0_i32_0, %c0_i32_1 : i32, i32, i32
  }
  func.func @transform_9(%arg0: i32) -> (i32, i32) {
    %c0_i32 = arith.constant 0 : i32
    %c0_i32_0 = arith.constant 0 : i32
    %c0_i32_1 = arith.constant 0 : i32
    return %c0_i32, %c0_i32_0 : i32, i32
  }
  func.func @transform_10(%arg0: i32) -> (i32, i32) {
    %c0_i32 = arith.constant 0 : i32
    %c0_i32_0 = arith.constant 0 : i32
    %c0_i32_1 = arith.constant 0 : i32
    return %c0_i32, %c0_i32_0 : i32, i32
  }
  func.func @transform_11(%arg0: i32) -> (i32, i32) {
    %c0_i32 = arith.constant 0 : i32
    %c0_i32_0 = arith.constant 0 : i32
    %c0_i32_1 = arith.constant 0 : i32
    return %c0_i32, %c0_i32_0 : i32, i32
  }
  func.func @transform_12(%arg0: i32) -> (i32, i32) {
    %c0_i32 = arith.constant 0 : i32
    %c0_i32_0 = arith.constant 0 : i32
    %c0_i32_1 = arith.constant 0 : i32
    return %c0_i32, %c0_i32_0 : i32, i32
  }
  func.func @transform_13(%arg0: i32) -> (i32, i32) {
    %c0_i32 = arith.constant 0 : i32
    %c0_i32_0 = arith.constant 0 : i32
    %c0_i32_1 = arith.constant 0 : i32
    return %c0_i32, %c0_i32_0 : i32, i32
  }
  func.func @transform_14(%arg0: i32) -> (i32, i32) {
    %c0_i32 = arith.constant 0 : i32
    %c0_i32_0 = arith.constant 0 : i32
    return %arg0, %c0_i32 : i32, i32
  }
}

</mosaic_0001>

<bundles_post_ra>
// kernel: tpu_custom_call.1
= control target key start
LH: loop header
LB: loop body
LE: loop exit
PB: predicated region body
PF: predicated region fallthrough
CT: control target
= control target key end

     0   :  { %19 = vsyncpa [#allocation3], 0  ;;  %s1274_s0 = inlined_call_operand.hbm [shape: f32[8,16], index: 0, kind: input, shape index: {}]   ;;  %s1275_s1 = inlined_call_operand.vmem [shape: f32[16,32], index: 1, kind: input, shape index: {}]   ;;  %s1276_s2 = inlined_call_operand.hbm [shape: f32[1,32], index: 2, kind: input, shape index: {}]   ;;  %s1277_s3 = inlined_call_operand.vmem [shape: f32[32,16], index: 3, kind: input, shape index: {}]   ;;  %s1278_s4 = inlined_call_operand.hbm [shape: f32[1,16], index: 4, kind: input, shape index: {}]   ;;  %s1279_s5 = inlined_call_operand.hbm [shape: f32[16,12], index: 5, kind: input, shape index: {}]   ;;  %s1280_s6 = inlined_call_operand.hbm [shape: f32[1,12], index: 6, kind: input, shape index: {}]   ;;  %s1281_s7 = inlined_call_operand.hbm [shape: f32[1,12], index: 7, kind: input, shape index: {}]   ;;  %s1282_s8 = inlined_call_operand.vmem [shape: f32[6,12,64], index: 8, kind: input, shape index: {}]   ;;  %s1283_s9 = inlined_call_operand.vmem [shape: f32[64,128], index: 9, kind: input, shape index: {}]   ;;  %s1284_s10 = inlined_call_operand.vmem [shape: f32[128,16], index: 10, kind: input, shape index: {}]   ;;  %s1285_s11 = inlined_call_operand.hbm [shape: f32[1,16], index: 11, kind: input, shape index: {}]   ;;  %s1286_s12 = inlined_call_operand.vmem [shape: bf16[16,128], index: 12, kind: input, shape index: {}]   ;;  %s1287_s13 = inlined_call_operand.vmem [shape: f32[1,128], index: 13, kind: input, shape index: {}]   ;;  %s1288_s14 = inlined_call_operand.hbm [shape: bf16[8,128], index: 14, kind: output, shape index: {}]  }
   0x1   :  { %20 = vsyncpa [#allocation6], 0 }
   0x2   :  { %21 = vsyncpa [#allocation9], 0 }
   0x3   :  { %22 = vsyncpa [#allocation12], 0  ;;  %s42_s15 = sshll.u32 %s1276_s2, 4  ;;  %s43_s15 = int_to_ptr.hbm [resolvable:$true] %s42_s15 }
   0x4   :  { %23 = vsyncpa [#allocation4], 0  ;;  %s953_s16 = smov [#allocation5]   ;;  %s65_s20 = sshll.u32 %s1279_s5, 4  ;;  %s66_s20 = int_to_ptr.hbm [resolvable:$true] %s65_s20 }
   0x5   :  { %s44_s17 = sshll.u32 %s953_s16, 4  ;;  %s954_s21 = smov [#allocation8]   ;;  %s45_s17 = int_to_ptr.vmem [resolvable:$true] %s44_s17 }
   0x6   :  { %47 = dma.hbm_to_vmem [thread:$0]  %s43_s15, 16, %s45_s17, [#allocation6]  }
   0x7   :  { %s67_s22 = sshll.u32 %s954_s21, 4  ;;  %s955_s23 = smov 128   ;;  %s68_s22 = int_to_ptr.vmem [resolvable:$true] %s67_s22 }
   0x8   :  { %s956_s24 = smov 8   ;;  %s90_s2 = sshll.u32 %s1281_s7, 4  ;;  %s91_s2 = int_to_ptr.hbm [resolvable:$true] %s90_s2 }
   0x9   :  { %73 = dma.hbm_to_vmem [thread:$0]  %s66_s20, 256, %s68_s22, [#allocation9], %s955_s23, %s955_s23, %s956_s24  }
   0xa   :  { %s957_s27 = smov [#allocation11]   ;;  %s29_s5 = sshll.u32 %s1274_s0, 4  ;;  %s30_s5 = int_to_ptr.hbm [resolvable:$true] %s29_s5 }
   0xb   :  { %s92_s28 = sshll.u32 %s957_s27, 4  ;;  %s958_s15 = smov [#allocation2]   ;;  %s93_s28 = int_to_ptr.vmem [resolvable:$true] %s92_s28 }
   0xc   :  { %95 = dma.hbm_to_vmem [thread:$0]  %s91_s2, 16, %s93_s28, [#allocation12]  }
   0xd   :  { %s31_s16 = sshll.u32 %s958_s15, 4  ;;  %s55_s19 = sshll.u32 %s1278_s4, 4  ;;  %s32_s16 = int_to_ptr.vmem [resolvable:$true] %s31_s16  ;;  %s56_s19 = int_to_ptr.hbm [resolvable:$true] %s55_s19 }
   0xe   :  { %34 = dma.hbm_to_vmem [thread:$0]  %s30_s5, 128, %s32_s16, [#allocation3]  }
   0xf   :  { %s79_s21 = sshll.u32 %s1280_s6, 4  ;;  %s959_s22 = smov [#allocation7]   ;;  %s80_s21 = int_to_ptr.hbm [resolvable:$true] %s79_s21 }
  0x10   :  { %s57_s23 = sshll.u32 %s959_s22, 4  ;;  %s960_s0 = smov [#allocation10]   ;;  %s58_s23 = int_to_ptr.vmem [resolvable:$true] %s57_s23 }
  0x11   :  { %60 = dma.hbm_to_vmem [thread:$0]  %s56_s19, 16, %s58_s23, [#allocation6]  }
  0x12   :  { %s81_s24 = sshll.u32 %s960_s0, 4  ;;  %s107_s2 = sshll.u32 %s1285_s11, 4  ;;  %s82_s24 = int_to_ptr.vmem [resolvable:$true] %s81_s24  ;;  %s108_s2 = int_to_ptr.hbm [resolvable:$true] %s107_s2 }
  0x13   :  { %84 = dma.hbm_to_vmem [thread:$0]  %s80_s21, 16, %s82_s24, [#allocation9]  }
  0x14   :  { %s961_s4 = smov [#allocation13]  }
  0x15   :  { %s109_s27 = sshll.u32 %s961_s4, 4  ;;  %s110_s27 = int_to_ptr.vmem [resolvable:$true] %s109_s27 }
  0x16   :  { %112 = dma.hbm_to_vmem [thread:$0]  %s108_s2, 16, %s110_s27, [#allocation12]  }
  0x17   :  { %943 = dma.done.wait [#allocation3], 128  }
  0x18   :  { %944 = vsyncadd [#allocation3], 4294967168 }
  0x19   :  { %945 = dma.done.wait [#allocation6], 32  }
  0x1a   :  { %946 = vsyncadd [#allocation6], 4294967264 }
  0x1b   :  { %947 = dma.done.wait [#allocation9], 272  }
  0x1c   :  { %948 = vsyncadd [#allocation9], 4294967024 }
  0x1d   :  { %949 = dma.done.wait [#allocation12], 32  }
  0x1e   :  { %950 = vsyncadd [#allocation12], 4294967264  ;;  %v148_v0 = vld [vmem:[%s1275_s1 + $0x8] sm:$0xff]  ;;  %v147_v1 = vld [vmem:[%s1275_s1] sm:$0xff]  ;;  %vm153_vm0 = vcmask 130048   ;;  %vm186_vm1 = vcmask 261120  }
  0x1f   :  { %171 = vmatpush.msra.mxu0 %v148_v0  ;;  %v146_v2 = vld [vmem:[#allocation2] sm:$0xff]  ;;  %v181_v3 = vld [vmem:[%s1277_s3 + $0x18] sm:$0xff]  ;;  %v180_v4 = vld [vmem:[%s1277_s3 + $0x10] sm:$0xff]  ;;  %vm407_vm2 = vcmask 1043456   ;;  %v962_v43 = vmov 683565275  }
  0x20   :  { %202 = vmatpush.msra.mxu1 %v181_v3  ;;  %v179_v5 = vld [vmem:[%s1277_s3 + $0x8] sm:$0xff]  ;;  %v178_v6 = vld [vmem:[%s1277_s3] sm:$0xff]  ;;  %v212_v11 = vld [vmem:[#allocation8 + $0x8] sm:$0xff]  ;;  %v963_v45 = vmov 2475754826   ;;  %s678_s19 = sshll.u32 %s1288_s14, 4  ;;  %s679_s19 = int_to_ptr.hbm [resolvable:$true] %s678_s19 }
  0x21   :  { %172 = vmatpush.msra.mxu0 %v147_v1  ;;  %v743_v7 = vld [vmem:[#allocation5] ss:$0 sm:$0xff]  ;;  %234 = vmatpush.msra.mxu2 %v212_v11  ;;  %v211_v12 = vld [vmem:[#allocation8] sm:$0xff]  ;;  %v744_v13 = vld [vmem:[#allocation7] ss:$0 sm:$0xff] }
  0x22   :  { %691 = vmatmul.msk.f32.vlgmr.msra.gmra.mxu0 %vm153_vm0, %v146_v2  ;;  %203 = vmatpush.msra.mxu1 %v180_v4  ;;  %v745_v17 = vld [vmem:[#allocation10] ss:$0 sm:$0xff]  ;;  %v746_v20 = vld [vmem:[#allocation11] ss:$0 sm:$0xff]  ;;  %v402_v24 = vld [vmem:[%s1282_s8 + $0x8] sm:$0xf] }
  0x23   :  { %235 = vmatpush.msra.mxu2 %v211_v12  ;;  %v401_v25 = vld [vmem:[%s1282_s8] sm:$0xff]  ;;  %v704_v26 = vld [vmem:[%s1282_s8 + $0x28] sm:$0xf]  ;;  %697 = vmatpush.msk.msrb.mxu0 %vm407_vm2, %v402_v24  ;;  %v708_v27 = vld [vmem:[%s1282_s8 + $0x38] sm:$0xf] }
  0x24   :  { %204 = vmatpush.msra.mxu1 %v179_v5  ;;  %v712_v28 = vld [vmem:[%s1282_s8 + $0x48] sm:$0xf]  ;;  %v703_v29 = vld [vmem:[%s1282_s8 + $0x20] sm:$0xff]  ;;  %709 = vmatpush.msk.msra.mxu3 %vm407_vm2, %v708_v27  ;;  %v707_v31 = vld [vmem:[%s1282_s8 + $0x30] sm:$0xff]  ;;  %v964_v48 = vmov 2131351028  }
  0x25   :  { %705 = vmatpush.msk.msrb.mxu2 %vm407_vm2, %v704_v26  ;;  %v711_v32 = vld [vmem:[%s1282_s8 + $0x40] sm:$0xff]  ;;  %426 = vmatpush.msrb.mxu0 %v401_v25  ;;  %v965_v51 = vmov 2102212464   ;;  %v966_v54 = vmov 920167782  }
  0x26   :  { %205 = vmatpush.msra.mxu1 %v178_v6  ;;  %505 = vmatpush.msra.mxu3 %v707_v31  ;;  %v967_v57 = vmov 1326507024  }
  0x27   :  { %479 = vmatpush.msrb.mxu2 %v703_v29 }
  0x28   :  { %713 = vmatpush.msk.msrb.mxu1 %vm407_vm2, %v712_v28  ;;  %v968_v28 = vmov 0  }
  0x2a   :  { %533 = vmatpush.msrb.mxu1 %v711_v32 }
  0x9f   :  { %v174_v8 = vpop.f32.mrf.mxu0 }
  0xa0   :  { %v175_v9 = vadd.f32 %v743_v7, %v174_v8 }
  0xa2   :  { %v177_v10 = vmax.f32 %v175_v9, 0.0 }
  0xa4   :  { %692 = vmatmul.msk.f32.vlgmr.msra.gmra.mxu1 %vm186_vm1, %v177_v10 }
 0x121   :  { %v207_v14 = vpop.f32.mrf.mxu1 }
 0x122   :  { %v208_v15 = vadd.f32 %v744_v13, %v207_v14 }
 0x124   :  { %v210_v16 = vmax.f32 %v208_v15, 0.0 }
 0x126   :  { %693 = vmatmul.msk.f32.vlgmr.msra.gmra.mxu2 %vm153_vm0, %v210_v16 }
 0x1a9   :  { %v237_v18 = vpop.f32.mrf.mxu2 }
 0x1aa   :  { %v238_v19 = vadd.f32 %v745_v17, %v237_v18 }
 0x1ac   :  { %749 = vtanh.f32 %v238_v19 }
 0x1b2   :  { %v750_v21 = vpop.eup %749 }
 0x1b3   :  { %v241_v22 = vmul.f32 1.5707964, %v750_v21 }
 0x1b5   :  { %v1086_v23 = vadd.f32 %v746_v20, %v241_v22 }
 0x1b7   :  { %v250_v30 = vand.u32 2139095040, %v1086_v23  ;;  %v247_v35 = vand.u32 2147483647, %v1086_v23  ;;  %vm249_vm15 = vcmp.lt.s32.totalorder %v1086_v23, 0 }
 0x1b9   :  { %v251_v33 = vshrl.u32 %v250_v30, 23  ;;  %v254_v37 = vand.u32 8388607, %v247_v35  ;;  %vm1175_vm1 = vcmp.le.f32.partialorder %v247_v35, 0.7853982 }
 0x1bb   :  { %v694_v34 = vadd.s32 4294967169, %v251_v33  ;;  %v255_v41 = vor.u32 8388608, %v254_v37 }
 0x1bd   :  { %v257_v36 = vadd.s32 1, %v694_v34  ;;  %v1131_v0 = vshll.u32 %v255_v41, 8 }
 0x1bf   :  { %vm258_vm3 = vcmp.gt.s32.totalorder %v257_v36, 0  ;;  %v296_v9 = vand.u32 65535, %v1131_v0  ;;  %v297_v10 = vshrl.u32 %v1131_v0, 16 }
 0x1c0   :  { %v259_v38 = vsel %vm258_vm3, %v257_v36, 0 }
 0x1c1   :  { %v261_v39 = vand.u32 31, %v259_v38  ;;  %v1122_v42 = vshrl.u32 %v259_v38, 5 }
 0x1c3   :  { %v1120_v40 = vsub.s32 32, %v261_v39  ;;  %v264_v44 = vshll.u32 %v962_v43, %v261_v39  ;;  %v267_v46 = vshll.u32 %v963_v45, %v261_v39  ;;  %v270_v50 = vshll.u32 %v964_v48, %v261_v39 }
 0x1c4   :  { %v273_v53 = vshll.u32 %v965_v51, %v261_v39  ;;  %v276_v56 = vshll.u32 %v966_v54, %v261_v39  ;;  %vm279_vm4 = vcmp.lt.s32.totalorder %v1122_v42, 1  ;;  %vm282_vm5 = vcmp.lt.s32.totalorder %v1122_v42, 4 }
 0x1c5   :  { %v265_v47 = vshrl.u32 %v963_v45, %v1120_v40  ;;  %v268_v49 = vshrl.u32 %v964_v48, %v1120_v40  ;;  %v271_v52 = vshrl.u32 %v965_v51, %v1120_v40  ;;  %v274_v55 = vshrl.u32 %v966_v54, %v1120_v40 }
 0x1c6   :  { %v277_v58 = vshrl.u32 %v967_v57, %v1120_v40  ;;  %vm281_vm6 = vcmp.lt.s32.totalorder %v1122_v42, 3  ;;  %vm280_vm7 = vcmp.lt.s32.totalorder %v1122_v42, 2  ;;  %v263_v38 = vshrl.u32 %v962_v43, %v1120_v40 }
 0x1c7   :  { %v266_v59 = vor.u32 %v265_v47, %v264_v44  ;;  %v269_v60 = vor.u32 %v268_v49, %v267_v46  ;;  %v272_v61 = vor.u32 %v271_v52, %v270_v50  ;;  %v275_v62 = vor.u32 %v274_v55, %v273_v53 }
 0x1c8   :  { %v278_v63 = vor.u32 %v277_v58, %v276_v56 }
 0x1c9   :  { %v287_v1 = vsel %vm279_vm4, %v266_v59, %v269_v60  ;;  %v291_v2 = vsel %vm279_vm4, %v269_v60, %v272_v61  ;;  %v288_v3 = vsel %vm282_vm5, %v275_v62, 920167782  ;;  %v284_v34 = vsel %vm282_vm5, %v272_v61, 2102212464 }
 0x1ca   :  { %v292_v4 = vsel %vm282_vm5, %v278_v63, 1326507024  ;;  %v289_v5 = vsel %vm281_vm6, %v272_v61, %v288_v3  ;;  %v283_v47 = vsel %vm279_vm4, %v263_v38, %v266_v59  ;;  %v285_v48 = vsel %vm281_vm6, %v269_v60, %v284_v34 }
 0x1cb   :  { %v293_v6 = vsel %vm281_vm6, %v275_v62, %v292_v4  ;;  %v290_v7 = vsel %vm280_vm7, %v287_v1, %v289_v5  ;;  %v286_v40 = vsel %vm280_vm7, %v283_v47, %v285_v48  ;;  %vm403_vm6 = vcmask 97280  }
 0x1cc   :  { %v294_v8 = vsel %vm280_vm7, %v291_v2, %v293_v6  ;;  %v320_v13 = vand.u32 65535, %v290_v7  ;;  %v321_v14 = vshrl.u32 %v290_v7, 16  ;;  %v340_v56 = vmul.u32 %v1131_v0, %v286_v40  ;;  %v568_v40 = vld [vmem:[%s1283_s9 + $0x10] sm:$0xff] }
 0x1cd   :  { %v298_v11 = vand.u32 65535, %v294_v8  ;;  %v299_v12 = vshrl.u32 %v294_v8, 16  ;;  %vm390_vm7 = vweird.f32 %v1086_v23 }
 0x1ce   :  { %v323_v17 = vmul.u32 %v321_v14, %v296_v9  ;;  %v324_v18 = vmul.u32 %v320_v13, %v297_v10  ;;  %v322_v22 = vmul.u32 %v320_v13, %v296_v9  ;;  %v325_v27 = vmul.u32 %v321_v14, %v297_v10  ;;  %v699_v13 = vld [vmem:[%s1282_s8 + $0x10] sm:$0xff] }
 0x1cf   :  { %v301_v15 = vmul.u32 %v299_v12, %v296_v9  ;;  %v302_v16 = vmul.u32 %v298_v11, %v297_v10  ;;  %v300_v19 = vmul.u32 %v298_v11, %v296_v9  ;;  %v303_v21 = vmul.u32 %v299_v12, %v297_v10  ;;  %v700_v11 = vld [vmem:[%s1282_s8 + $0x18] sm:$0xf] }
 0x1d0   :  { %v326_v24 = vshll.u32 %v323_v17, 16  ;;  %v328_v30 = vshll.u32 %v324_v18, 16  ;;  %v327_v45 = vshrl.u32 %v323_v17, 16  ;;  %v329_v51 = vshrl.u32 %v324_v18, 16  ;;  %701 = vmatpush.msk.msra.mxu0 %vm407_vm2, %v700_v11  ;;  %v725_v18 = vld [vmem:[%s1286_s12] sm:$0xff] }
 0x1d1   :  { %v304_v20 = vshll.u32 %v301_v15, 16  ;;  %v306_v25 = vshll.u32 %v302_v16, 16  ;;  %v305_v39 = vshrl.u32 %v301_v15, 16  ;;  %v307_v49 = vshrl.u32 %v302_v16, 16  ;;  %663 = vmatpush.bf16.msra.mxu1 %v725_v18 }
 0x1d2   :  { %vm330_vm9 = vc.u32 %v322_v22, %v326_v24  ;;  %v332_v31 = vadd.s32 %v326_v24, %v322_v22  ;;  %452 = vmatpush.msra.mxu0 %v699_v13 }
 0x1d3   :  { %vm308_vm8 = vc.u32 %v300_v19, %v304_v20  ;;  %v310_v26 = vadd.s32 %v304_v20, %v300_v19  ;;  %v331_v33 = vsel %vm330_vm9, 1, %v968_v28 }
 0x1d4   :  { %v309_v29 = vsel %vm308_vm8, 1, %v968_v28  ;;  %v333_v37 = vadd.s32 %v331_v33, %v325_v27  ;;  %vm334_vm11 = vc.u32 %v332_v31, %v328_v30  ;;  %v336_v54 = vadd.s32 %v332_v31, %v328_v30 }
 0x1d5   :  { %v311_v32 = vadd.s32 %v309_v29, %v303_v21  ;;  %vm312_vm10 = vc.u32 %v310_v26, %v306_v25  ;;  %v335_v44 = vsel %vm334_vm11, 1, %v968_v28 }
 0x1d6   :  { %v313_v36 = vsel %vm312_vm10, 1, %v968_v28  ;;  %v337_v46 = vadd.s32 %v335_v44, %v333_v37 }
 0x1d7   :  { %v315_v41 = vadd.s32 %v313_v36, %v311_v32 }
 0x1d8   :  { %v338_v52 = vadd.s32 %v337_v46, %v327_v45 }
 0x1d9   :  { %v316_v50 = vadd.s32 %v315_v41, %v305_v39 }
 0x1da   :  { %v339_v43 = vadd.s32 %v338_v52, %v329_v51  ;;  %v572_v51 = vld [vmem:[%s1283_s9 + $0x30] sm:$0xff]  ;;  %v571_v52 = vld [vmem:[%s1283_s9 + $0x28] sm:$0xff] }
 0x1db   :  { %v317_v53 = vadd.s32 %v316_v50, %v307_v49  ;;  %v716_v49 = vld [vmem:[%s1282_s8 + $0x58] sm:$0xf]  ;;  %v715_v50 = vld [vmem:[%s1282_s8 + $0x50] sm:$0xff] }
 0x1dc   :  { %v343_v55 = vadd.s32 1, %v339_v43 }
 0x1dd   :  { %vm342_vm12 = vc.u32 %v317_v53, %v336_v54  ;;  %v341_v42 = vadd.s32 %v336_v54, %v317_v53  ;;  %v570_v53 = vld [vmem:[%s1283_s9 + $0x20] sm:$0xff]  ;;  %v569_v54 = vld [vmem:[%s1283_s9 + $0x18] sm:$0xff] }
 0x1de   :  { %v344_v57 = vsel %vm342_vm12, %v343_v55, %v339_v43  ;;  %v567_v43 = vld [vmem:[%s1283_s9 + $0x8] sm:$0xff]  ;;  %v566_v55 = vld [vmem:[%s1283_s9] sm:$0xff] }
 0x1df   :  { %v345_v58 = vadd.s32 %v344_v57, %v340_v56  ;;  %v614_v56 = vld [vmem:[%s1284_s10 + $0x78] sm:$0xff]  ;;  %v613_v57 = vld [vmem:[%s1284_s10 + $0x70] sm:$0xff] }
 0x1e0   :  { %619 = vmatpush.msrb.mxu3 %v614_v56 }
 0x1e1   :  { %v346_v59 = vadd.s32 536870912, %v345_v58 }
 0x1e2   :  { %620 = vmatpush.msrb.mxu3 %v613_v57 }
 0x1e3   :  { %v347_v61 = vshrl.u32 %v346_v59, 30  ;;  %v611_v59 = vld [vmem:[%s1284_s10 + $0x60] sm:$0xff] }
 0x1e5   :  { %v348_v62 = vshll.u32 %v347_v61, 30  ;;  %v371_v25 = vsub.s32 4, %v347_v61 }
 0x1e7   :  { %v349_v60 = vsub.s32 %v345_v58, %v348_v62  ;;  %v372_v30 = vsel %vm249_vm15, %v371_v25, %v347_v61  ;;  %v612_v58 = vld [vmem:[%s1284_s10 + $0x68] sm:$0xff]  ;;  %v610_v61 = vld [vmem:[%s1284_s10 + $0x58] sm:$0xff]  ;;  %v609_v62 = vld [vmem:[%s1284_s10 + $0x50] sm:$0xff] }
 0x1e8   :  { %v374_v35 = vsel %vm1175_vm1, 0, %v372_v30  ;;  %621 = vmatpush.msrb.mxu3 %v612_v58 }
 0x1e9   :  { %vm350_vm13 = vcmp.lt.s32.totalorder %v349_v60, 0  ;;  %v351_v63 = vsub.s32 0, %v349_v60  ;;  %v391_v38 = vand.u32 3, %v374_v35 }
 0x1ea   :  { %622 = vmatpush.msrb.mxu3 %v611_v59 }
 0x1eb   :  { %v352_v1 = vsel %vm350_vm13, %v351_v63, %v349_v60  ;;  %vm393_vm3 = vcmp.eq.s32.totalorder %v391_v38, 0  ;;  %vm396_vm4 = vcmp.eq.s32.totalorder %v391_v38, 2  ;;  %vm392_vm5 = vcmp.lt.s32.totalorder %v391_v38, 2 }
 0x1ec   :  { %v353_v2 = vclz %v352_v1  ;;  %623 = vmatpush.msrb.mxu3 %v610_v61  ;;  %v607_v1 = vld [vmem:[%s1284_s10 + $0x40] sm:$0xff] }
 0x1ee   :  { %v695_v3 = vadd.s32 4294967294, %v353_v2  ;;  %624 = vmatpush.msrb.mxu3 %v609_v62  ;;  %v606_v2 = vld [vmem:[%s1284_s10 + $0x38] sm:$0xff] }
 0x1f0   :  { %vm696_vm14 = vcmp.lt.s32.totalorder %v695_v3, 0 }
 0x1f1   :  { %v356_v4 = vsel %vm696_vm14, 0, %v695_v3  ;;  %v605_v3 = vld [vmem:[%s1284_s10 + $0x30] sm:$0xff] }
 0x1f2   :  { %v357_v5 = vsub.s32 32, %v356_v4  ;;  %v361_v6 = vsub.s32 4294967266, %v356_v4  ;;  %v358_v7 = vshll.u32 %v349_v60, %v356_v4  ;;  %v608_v60 = vld [vmem:[%s1284_s10 + $0x48] sm:$0xff] }
 0x1f3   :  { %625 = vmatpush.msrb.mxu3 %v608_v60  ;;  %v604_v4 = vld [vmem:[%s1284_s10 + $0x28] sm:$0xff] }
 0x1f4   :  { %v359_v8 = vshrl.u32 %v341_v42, %v357_v5  ;;  %v362_v9 = vadd.s32 127, %v361_v6  ;;  %v603_v5 = vld [vmem:[%s1284_s10 + $0x20] sm:$0xff]  ;;  %v602_v6 = vld [vmem:[%s1284_s10 + $0x18] sm:$0xff] }
 0x1f5   :  { %626 = vmatpush.msrb.mxu3 %v607_v1 }
 0x1f6   :  { %v360_v0 = vor.u32 %v359_v8, %v358_v7  ;;  %v363_v10 = vshll.u32 %v362_v9, 23 }
 0x1f7   :  { %627 = vmatpush.msrb.mxu3 %v606_v2 }
 0x1f8   :  { %v364_v12 = vor.u32 4788187, %v363_v10  ;;  %v367_v15 = vcvt.s32.f32 %v360_v0  ;;  %v601_v0 = vld [vmem:[%s1284_s10 + $0x10] sm:$0xff] }
 0x1f9   :  { %628 = vmatpush.msrb.mxu3 %v605_v3 }
 0x1fa   :  { %v365_v14 = vand.u32 2147483647, %v364_v12 }
 0x1fb   :  { %629 = vmatpush.msrb.mxu3 %v604_v4 }
 0x1fc   :  { %v368_v16 = vmul.f32 %v367_v15, %v365_v14 }
 0x1fd   :  { %630 = vmatpush.msrb.mxu3 %v603_v5 }
 0x1fe   :  { %v369_v17 = vxor.u32 2147483648, %v368_v16 }
 0x1ff   :  { %631 = vmatpush.msrb.mxu3 %v602_v6 }
 0x200   :  { %v370_v19 = vsel %vm249_vm15, %v369_v17, %v368_v16  ;;  %v600_v16 = vld [vmem:[%s1284_s10 + $0x8] sm:$0xff]  ;;  %v599_v17 = vld [vmem:[%s1284_s10] sm:$0xff]  ;;  %s969_s10 = smov [#allocation14]  }
 0x201   :  { %v373_v20 = vsel %vm1175_vm1, %v1086_v23, %v370_v19  ;;  %v573_v23 = vld [vmem:[%s1283_s9 + $0x38] sm:$0xff]  ;;  %632 = vmatpush.msrb.mxu3 %v601_v0  ;;  %s676_s18 = sshll.u32 %s969_s10, 4  ;;  %s677_s18 = int_to_ptr.vmem [resolvable:$true] %s676_s18 }
 0x202   :  { %v375_v21 = vmul.f32 %v373_v20, %v373_v20  ;;  %586 = vmatpush.msra.mxu2 %v573_v23 }
 0x203   :  { %633 = vmatpush.msrb.mxu3 %v600_v16 }
 0x204   :  { %v376_v22 = vmul.f32 -0.001358992, %v375_v21  ;;  %v383_v24 = vmul.f32 -0.00019511016, %v375_v21  ;;  %587 = vmatpush.msra.mxu2 %v572_v51 }
 0x205   :  { %634 = vmatpush.msrb.mxu3 %v599_v17 }
 0x206   :  { %v377_v26 = vadd.f32 0.041655596, %v376_v22  ;;  %v384_v27 = vadd.f32 0.008332121, %v383_v24  ;;  %588 = vmatpush.msra.mxu2 %v571_v52 }
 0x208   :  { %v378_v28 = vmul.f32 %v377_v26, %v375_v21  ;;  %v385_v29 = vmul.f32 %v384_v27, %v375_v21  ;;  %589 = vmatpush.msra.mxu2 %v570_v53  ;;  %v748_v27 = vld [vmem:[%s1287_s13] ss:$0 sm:$0xff] }
 0x20a   :  { %v379_v31 = vadd.f32 -0.4999988, %v378_v28  ;;  %v386_v32 = vadd.f32 -0.16666654, %v385_v29  ;;  %590 = vmatpush.msra.mxu2 %v569_v54 }
 0x20c   :  { %v380_v33 = vmul.f32 %v379_v31, %v375_v21  ;;  %v387_v34 = vmul.f32 %v386_v32, %v375_v21  ;;  %591 = vmatpush.msra.mxu2 %v568_v40  ;;  %v747_v21 = vld [vmem:[#allocation13] ss:$0 sm:$0xff] }
 0x20e   :  { %v381_v36 = vadd.f32 1.0, %v380_v33  ;;  %v388_v37 = vadd.f32 1.0, %v387_v34  ;;  %592 = vmatpush.msra.mxu2 %v567_v43 }
 0x210   :  { %v389_v39 = vmul.f32 %v388_v37, %v373_v20  ;;  %v397_v41 = vxor.u32 2147483648, %v381_v36  ;;  %593 = vmatpush.msra.mxu2 %v566_v55 }
 0x212   :  { %v394_v44 = vxor.u32 2147483648, %v389_v39  ;;  %v398_v46 = vsel %vm396_vm4, %v397_v41, %v389_v39 }
 0x214   :  { %v395_v45 = vsel %vm393_vm3, %v381_v36, %v394_v44 }
 0x215   :  { %v399_v47 = vsel %vm392_vm5, %v395_v45, %v398_v46 }
 0x216   :  { %v400_v48 = vsel %vm390_vm7, nan, %v399_v47 }
 0x217   :  { %698 = vmatmul.msk.f32.vlgmr.msrb.gmra.mxu0 %vm403_vm6, %v400_v48  ;;  %706 = vmatmul.msk.f32.vlgmr.msrb.gmra.mxu2 %vm403_vm6, %v400_v48 }
 0x218   :  { %710 = vmatmul.msk.f32.vlgmr.msra.gmra.mxu3 %vm403_vm6, %v400_v48  ;;  %714 = vmatmul.msk.f32.vlgmr.msrb.gmra.mxu1 %vm403_vm6, %v400_v48 }
 0x219   :  { %717 = vmatpush.msk.msrb.mxu0 %vm407_vm2, %v716_v49  ;;  %vm574_vm2 = vcmask 523264  }
 0x21b   :  { %559 = vmatpush.msrb.mxu0 %v715_v50 }
 0x21f   :  { %702 = vmatmul.msk.f32.vlgmr.msra.gmra.mxu0 %vm403_vm6, %v400_v48 }
 0x227   :  { %718 = vmatmul.msk.f32.vlgmr.msrb.gmra.mxu0 %vm403_vm6, %v400_v48 }
 0x294   :  { %v428_v63 = vpop.f32.mrf.mxu0 }
 0x295   :  { %v535_v11 = vpop.f32.mrf.mxu1 }
 0x29a   :  { %v481_v7 = vpop.f32.mrf.mxu2 }
 0x29b   :  { %v507_v8 = vpop.f32.mrf.mxu3 }
 0x29c   :  { %v454_v42 = vpop.f32.mrf.mxu0  ;;  %v510_v10 = vmul.f32 %v507_v8, %v481_v7 }
 0x29d   :  { %v457_v9 = vmul.f32 %v454_v42, %v428_v63 }
 0x29f   :  { %v511_v13 = vmul.f32 %v510_v10, %v457_v9 }
 0x2a4   :  { %v561_v12 = vpop.f32.mrf.mxu0 }
 0x2a5   :  { %v564_v14 = vmul.f32 %v561_v12, %v535_v11 }
 0x2a7   :  { %v565_v15 = vmul.f32 %v564_v14, %v511_v13 }
 0x2a9   :  { %719 = vmatmul.msk.f32.vlgmr.msra.gmra.mxu2 %vm574_vm2, %v565_v15 }
 0x32c   :  { %v595_v19 = vpop.f32.mrf.mxu2 }
 0x32d   :  { %v598_v20 = vmul.f32 %v595_v19, %v595_v19 }
 0x32f   :  { %635 = vmatmul.f32.vlgmr.msrb.gmra.mxu3 %v598_v20 }
 0x3b2   :  { %v636_v22 = vpop.f32.mrf.mxu3 }
 0x3b3   :  { %v637_v24 = vadd.f32 %v747_v21, %v636_v22 }
 0x3b5   :  { %v639_v25 = vmax.f32 %v637_v24, 0.0 }
 0x3b7   :  { %v640_v26 = vpack.c.bf16 %v639_v25, %v639_v25 }
 0x3b9   :  { %724 = vmatmul.msk.bf16.vlgmr.msra.gmra.mxu1 %vm153_vm0, %v640_v26 }
 0x436   :  { %v665_v28 = vpop.f32.mrf.mxu1 }
 0x437   :  { %v666_v29 = vadd.f32 %v748_v27, %v665_v28 }
 0x439   :  { %v669_v30 = vpack.c.bf16 %v666_v29, %v666_v29 }
 0x43b   :  { %670 = vst [vmem:[#allocation14] sm:$0xf] %v669_v30 }
 0x43c   :  { %681 = dma.vmem_to_hbm [thread:$0]  %s677_s18, 64, %s679_s19, [#allocation4]  }
 0x43e   :  { %v667_v31 = vpop.f32.mrf.mxu1 }
 0x43f   :  { %951 = dma.done.wait [#allocation4], 64  }
 0x440   :  { %952 = vsyncadd [#allocation4], 4294967232 }
 0x441   :  { %686 = vsyncpa [#allocation3], 1 }
 0x442   :  { %687 = vsyncpa [#allocation6], 1 }
 0x443   :  { %688 = vsyncpa [#allocation9], 1 }
 0x444   :  { %689 = vsyncpa [#allocation12], 1 }
 0x445   :  { %690 = vsyncpa [#allocation4], 1 }

</bundles_post_ra>
